<compile_context>
chip_gen: v5e
topology: v5e:2x2
jax: 0.10.0
libtpu: 0.0.40
codegen_flags: <defaults>
</compile_context>

<pallas_src>
import jax
import jax.numpy as jnp
from jax.experimental import pallas as pl
from jax.experimental.pallas import tpu as pltpu

IN_F, HID_F, OUT_F = 100, 66, 100
PAD = 128  # lane-aligned width for the hidden layers


def _round_up(n, m):
    return ((n + m - 1) // m) * m


def mlp_kernel(x_ref, w1_ref, b1_ref, w2_ref, b2_ref, w3_ref, b3_ref, o_ref):
    hp = jax.lax.Precision.HIGHEST
    x = x_ref[...]  # (TB, 100) float32

    # Layer 1: Linear(100, 66) + Sigmoid.  Weight is (100, 128) (in, out_pad).
    z1 = jnp.dot(x, w1_ref[...], preferred_element_type=jnp.float32,
                 precision=hp) + b1_ref[...]
    a1 = jax.nn.sigmoid(z1)                      # padded lanes hold sigmoid(0)=0.5

    # Layer 2: Linear(66, 66) + Sigmoid.  Weight is (128, 128); zero K-rows
    # (66..127) make the 0.5 padded lanes of a1 contribute nothing.
    z2 = jnp.dot(a1, w2_ref[...], preferred_element_type=jnp.float32,
                 precision=hp) + b2_ref[...]
    a2 = jax.nn.sigmoid(z2)

    # Layer 3: Linear(66, 100).  Weight is (128, 100); zero K-rows again.
    z3 = jnp.dot(a2, w3_ref[...], preferred_element_type=jnp.float32,
                 precision=hp) + b3_ref[...]

    o_ref[...] = z3.astype(o_ref.dtype)          # (TB, 100) store


def init_params(key):
    """Logical params in the PyTorch nn.Linear convention: W (out, in), b (out,)."""
    k1, k2, k3, k4, k5, k6 = jax.random.split(key, 6)

    def lin(kw, kb, in_f, out_f):
        bound = 1.0 / (in_f ** 0.5)  # torch default uniform(+-1/sqrt(in))
        w = jax.random.uniform(kw, (out_f, in_f), jnp.float32, -bound, bound)
        b = jax.random.uniform(kb, (out_f,), jnp.float32, -bound, bound)
        return w, b

    w1, b1 = lin(k1, k2, IN_F, HID_F)
    w2, b2 = lin(k3, k4, HID_F, HID_F)
    w3, b3 = lin(k5, k6, HID_F, OUT_F)
    return (w1, b1, w2, b2, w3, b3)


def pack_params(params):
    """One-time layout plumbing: transpose to (in, out); pad only the hidden width.

    Zero-padding of the K-rows of layers 2 and 3 guarantees the padded hidden
    lanes (which hold sigmoid(0) = 0.5) contribute nothing, so results match
    the unpadded reference exactly.
    """
    w1, b1, w2, b2, w3, b3 = params
    f32 = lambda a: jnp.asarray(a, jnp.float32)

    # Layer 1: (66,100) -> (100, 128); input dim stays at its natural 100.
    w1p = jnp.zeros((IN_F, PAD), jnp.float32).at[:, :HID_F].set(f32(w1).T)
    b1p = jnp.zeros((1, PAD), jnp.float32).at[0, :HID_F].set(f32(b1))
    # Layer 2: (66,66) -> (128, 128); zero K-rows and zero out-columns.
    w2p = jnp.zeros((PAD, PAD), jnp.float32).at[:HID_F, :HID_F].set(f32(w2).T)
    b2p = jnp.zeros((1, PAD), jnp.float32).at[0, :HID_F].set(f32(b2))
    # Layer 3: (100,66) -> (128, 100); zero K-rows, natural output width.
    w3p = jnp.zeros((PAD, OUT_F), jnp.float32).at[:HID_F, :].set(f32(w3).T)
    b3p = f32(b3).reshape(1, OUT_F)
    return (w1p, b1p, w2p, b2p, w3p, b3p)


def _pick_batch_tile(batch, block_batch):
    """Batch tile: multiple of 8 sublanes, capped at block_batch, and split into
    >= 2 grid steps when the batch allows it so v7x's two TensorCores both get
    work from the 1-D parallel grid."""
    b8 = _round_up(max(batch, 1), 8)
    if b8 <= block_batch:
        return _round_up(pl.cdiv(b8, 2), 8) if b8 >= 16 else b8
    return block_batch


def neural_network_forward(x, packed_params, *, block_batch=2048):
    """x: (B, 100) any float dtype -> (B, 100) float32 (matches x.to(torch.float32))."""
    (w1p, b1p, w2p, b2p, w3p, b3p) = packed_params
    B = x.shape[0]
    x = x.astype(jnp.float32)          # the module's explicit cast; no padding copies

    TB = _pick_batch_tile(B, block_batch)
    grid = (pl.cdiv(B, TB),)           # ragged last block handled by Pallas

    resident = lambda i: (0, 0)        # weights/biases stay resident across steps

    # VMEM @ TB=2048: (TB,100)+(TB,100) f32 double-buffered ~= 3.2 MiB plus
    # ~0.4 MiB of weights — well under every generation's scoped-VMEM default.
    return pl.pallas_call(
        mlp_kernel,
        out_shape=jax.ShapeDtypeStruct((B, OUT_F), jnp.float32),
        grid=grid,
        in_specs=[
            pl.BlockSpec((TB, IN_F), lambda i: (i, 0)),   # x: batch-tiled, unpadded
            pl.BlockSpec((IN_F, PAD), resident), pl.BlockSpec((1, PAD), resident),
            pl.BlockSpec((PAD, PAD), resident), pl.BlockSpec((1, PAD), resident),
            pl.BlockSpec((PAD, OUT_F), resident), pl.BlockSpec((1, OUT_F), resident),
        ],
        out_specs=pl.BlockSpec((TB, OUT_F), lambda i: (i, 0)),  # direct (B,100) output
        compiler_params=pltpu.CompilerParams(
            dimension_semantics=("parallel",),
        ),
    )(x, w1p, b1p, w2p, b2p, w3p, b3p)


def reference_forward(x, params):
    (w1, b1, w2, b2, w3, b3) = params
    hp = jax.lax.Precision.HIGHEST
    x = x.astype(jnp.float32)
    a1 = jax.nn.sigmoid(jnp.dot(x, w1.T, precision=hp) + b1)
    a2 = jax.nn.sigmoid(jnp.dot(a1, w2.T, precision=hp) + b2)
    return jnp.dot(a2, w3.T, precision=hp) + b3


if __name__ == "__main__":
    key = jax.random.PRNGKey(0)
    kx, kp = jax.random.split(key)

    batch = 32
    x = jax.random.normal(kx, (batch, IN_F), jnp.float32)

    params = init_params(kp)
    packed = pack_params(params)

    out = neural_network_forward(x, packed)
    out = jax.block_until_ready(out)

    ref = reference_forward(x, params)
    assert out.shape == (batch, OUT_F)
    assert jnp.allclose(out, ref, atol=1e-4, rtol=1e-4)

    print("KERNEL_OK")
</pallas_src>

<mosaic_0001>
module attributes {stable_mosaic.version = 11 : i64} {
  func.func @mlp_kernel(%arg0: i32, %arg1: memref<16x100xf32, #tpu.memory_space<vmem>>, %arg2: memref<100x128xf32, #tpu.memory_space<vmem>>, %arg3: memref<1x128xf32, #tpu.memory_space<vmem>>, %arg4: memref<128x128xf32, #tpu.memory_space<vmem>>, %arg5: memref<1x128xf32, #tpu.memory_space<vmem>>, %arg6: memref<128x100xf32, #tpu.memory_space<vmem>>, %arg7: memref<1x100xf32, #tpu.memory_space<vmem>>, %arg8: memref<16x100xf32, #tpu.memory_space<vmem>>) attributes {dimension_semantics = [#tpu.dimension_semantics<parallel>], iteration_bounds = array<i64: 2>, scalar_prefetch = 0 : i64, scratch_operands = 0 : i64, tpu.core_type = #tpu.core_type<tc>, window_params = [{transform_indices = @transform_0, window_bounds = array<i64: 16, 100>}, {pipeline_mode = #tpu.pipeline_mode<synchronous>, transform_indices = @transform_1, window_bounds = array<i64: 100, 128>}, {pipeline_mode = #tpu.pipeline_mode<synchronous>, transform_indices = @transform_2, window_bounds = array<i64: 1, 128>}, {pipeline_mode = #tpu.pipeline_mode<synchronous>, transform_indices = @transform_3, window_bounds = array<i64: 128, 128>}, {pipeline_mode = #tpu.pipeline_mode<synchronous>, transform_indices = @transform_4, window_bounds = array<i64: 1, 128>}, {pipeline_mode = #tpu.pipeline_mode<synchronous>, transform_indices = @transform_5, window_bounds = array<i64: 128, 100>}, {pipeline_mode = #tpu.pipeline_mode<synchronous>, transform_indices = @transform_6, window_bounds = array<i64: 1, 100>}, {transform_indices = @transform_7, window_bounds = array<i64: 16, 100>}]} {
    %c0 = arith.constant 0 : index
    %c0_0 = arith.constant 0 : index
    %0 = vector.load %arg1[%c0, %c0_0] : memref<16x100xf32, #tpu.memory_space<vmem>>, vector<16x100xf32>
    %c0_1 = arith.constant 0 : index
    %c0_2 = arith.constant 0 : index
    %1 = vector.load %arg2[%c0_1, %c0_2] : memref<100x128xf32, #tpu.memory_space<vmem>>, vector<100x128xf32>
    %cst = arith.constant dense<0.000000e+00> : vector<16x128xf32>
    %2 = tpu.matmul %0, %1, %cst {dimension_numbers = #tpu.dot_dimension_numbers<[1], [0], [0], [1], [0, 0, 1, 1], [], []>, precision = #tpu.contract_precision<fp32>} : vector<16x100xf32>, vector<100x128xf32>, vector<16x128xf32> -> vector<16x128xf32>
    %c0_3 = arith.constant 0 : index
    %c0_4 = arith.constant 0 : index
    %3 = vector.load %arg3[%c0_3, %c0_4] : memref<1x128xf32, #tpu.memory_space<vmem>>, vector<1x128xf32>
    %4 = vector.broadcast %3 : vector<1x128xf32> to vector<16x128xf32>
    %5 = arith.addf %2, %4 : vector<16x128xf32>
    %6 = arith.negf %5 : vector<16x128xf32>
    %7 = math.exp %6 : vector<16x128xf32>
    %cst_5 = arith.constant 1.000000e+00 : f32
    %8 = vector.broadcast %cst_5 : f32 to vector<16x128xf32>
    %9 = arith.addf %8, %7 : vector<16x128xf32>
    %10 = arith.divf %8, %9 : vector<16x128xf32>
    %c0_6 = arith.constant 0 : index
    %c0_7 = arith.constant 0 : index
    %11 = vector.load %arg4[%c0_6, %c0_7] : memref<128x128xf32, #tpu.memory_space<vmem>>, vector<128x128xf32>
    %cst_8 = arith.constant dense<0.000000e+00> : vector<16x128xf32>
    %12 = tpu.matmul %10, %11, %cst_8 {dimension_numbers = #tpu.dot_dimension_numbers<[1], [0], [0], [1], [0, 0, 1, 1], [], []>, precision = #tpu.contract_precision<fp32>} : vector<16x128xf32>, vector<128x128xf32>, vector<16x128xf32> -> vector<16x128xf32>
    %c0_9 = arith.constant 0 : index
    %c0_10 = arith.constant 0 : index
    %13 = vector.load %arg5[%c0_9, %c0_10] : memref<1x128xf32, #tpu.memory_space<vmem>>, vector<1x128xf32>
    %14 = vector.broadcast %13 : vector<1x128xf32> to vector<16x128xf32>
    %15 = arith.addf %12, %14 : vector<16x128xf32>
    %16 = arith.negf %15 : vector<16x128xf32>
    %17 = math.exp %16 : vector<16x128xf32>
    %cst_11 = arith.constant 1.000000e+00 : f32
    %18 = vector.broadcast %cst_11 : f32 to vector<16x128xf32>
    %19 = arith.addf %18, %17 : vector<16x128xf32>
    %20 = arith.divf %18, %19 : vector<16x128xf32>
    %c0_12 = arith.constant 0 : index
    %c0_13 = arith.constant 0 : index
    %21 = vector.load %arg6[%c0_12, %c0_13] : memref<128x100xf32, #tpu.memory_space<vmem>>, vector<128x100xf32>
    %cst_14 = arith.constant dense<0.000000e+00> : vector<16x100xf32>
    %22 = tpu.matmul %20, %21, %cst_14 {dimension_numbers = #tpu.dot_dimension_numbers<[1], [0], [0], [1], [0, 0, 1, 1], [], []>, precision = #tpu.contract_precision<fp32>} : vector<16x128xf32>, vector<128x100xf32>, vector<16x100xf32> -> vector<16x100xf32>
    %c0_15 = arith.constant 0 : index
    %c0_16 = arith.constant 0 : index
    %23 = vector.load %arg7[%c0_15, %c0_16] : memref<1x100xf32, #tpu.memory_space<vmem>>, vector<1x100xf32>
    %24 = vector.broadcast %23 : vector<1x100xf32> to vector<16x100xf32>
    %25 = arith.addf %22, %24 : vector<16x100xf32>
    %c0_17 = arith.constant 0 : index
    %c0_18 = arith.constant 0 : index
    %26 = vector.load %arg8[%c0_17, %c0_18] : memref<16x100xf32, #tpu.memory_space<vmem>>, vector<16x100xf32>
    tpu.vector_store %arg8[%c0_17, %c0_18], %25 {strides = array<i32>} : memref<16x100xf32, #tpu.memory_space<vmem>>, vector<16x100xf32>,
    return
  }
  func.func @transform_0(%arg0: i32) -> (i32, i32) {
    %c0_i32 = arith.constant 0 : i32
    %c0_i32_0 = arith.constant 0 : i32
    return %arg0, %c0_i32 : i32, i32
  }
  func.func @transform_1(%arg0: i32) -> (i32, i32) {
    %c0_i32 = arith.constant 0 : i32
    %c0_i32_0 = arith.constant 0 : i32
    %c0_i32_1 = arith.constant 0 : i32
    return %c0_i32, %c0_i32_0 : i32, i32
  }
  func.func @transform_2(%arg0: i32) -> (i32, i32) {
    %c0_i32 = arith.constant 0 : i32
    %c0_i32_0 = arith.constant 0 : i32
    %c0_i32_1 = arith.constant 0 : i32
    return %c0_i32, %c0_i32_0 : i32, i32
  }
  func.func @transform_3(%arg0: i32) -> (i32, i32) {
    %c0_i32 = arith.constant 0 : i32
    %c0_i32_0 = arith.constant 0 : i32
    %c0_i32_1 = arith.constant 0 : i32
    return %c0_i32, %c0_i32_0 : i32, i32
  }
  func.func @transform_4(%arg0: i32) -> (i32, i32) {
    %c0_i32 = arith.constant 0 : i32
    %c0_i32_0 = arith.constant 0 : i32
    %c0_i32_1 = arith.constant 0 : i32
    return %c0_i32, %c0_i32_0 : i32, i32
  }
  func.func @transform_5(%arg0: i32) -> (i32, i32) {
    %c0_i32 = arith.constant 0 : i32
    %c0_i32_0 = arith.constant 0 : i32
    %c0_i32_1 = arith.constant 0 : i32
    return %c0_i32, %c0_i32_0 : i32, i32
  }
  func.func @transform_6(%arg0: i32) -> (i32, i32) {
    %c0_i32 = arith.constant 0 : i32
    %c0_i32_0 = arith.constant 0 : i32
    %c0_i32_1 = arith.constant 0 : i32
    return %c0_i32, %c0_i32_0 : i32, i32
  }
  func.func @transform_7(%arg0: i32) -> (i32, i32) {
    %c0_i32 = arith.constant 0 : i32
    %c0_i32_0 = arith.constant 0 : i32
    return %arg0, %c0_i32 : i32, i32
  }
}

</mosaic_0001>

<bundles_post_ra>
// kernel: tpu_custom_call.1
= control target key start
LH: loop header
LB: loop body
LE: loop exit
PB: predicated region body
PF: predicated region fallthrough
CT: control target
= control target key end

     0   :  { %12 = vsyncpa [#allocation3], 0  ;;  %s2792_s0 = inlined_call_operand.hbm [shape: f32[32,100], index: 0, kind: input, shape index: {}]   ;;  %s2793_s1 = inlined_call_operand.vmem [shape: f32[100,128], index: 1, kind: input, shape index: {}]   ;;  %s2794_s2 = inlined_call_operand.vmem [shape: f32[1,128], index: 2, kind: input, shape index: {}]   ;;  %s2795_s3 = inlined_call_operand.vmem [shape: f32[128,128], index: 3, kind: input, shape index: {}]   ;;  %s2796_s4 = inlined_call_operand.vmem [shape: f32[1,128], index: 4, kind: input, shape index: {}]   ;;  %s2797_s5 = inlined_call_operand.vmem [shape: f32[128,100], index: 5, kind: input, shape index: {}]   ;;  %s2798_s6 = inlined_call_operand.vmem [shape: f32[1,100], index: 6, kind: input, shape index: {}]   ;;  %s2799_s7 = inlined_call_operand.hbm [shape: f32[32,100], index: 7, kind: output, shape index: {}]  }
   0x1   :  { %14 = vsyncpa [#allocation3 + $0x1], 0 }
   0x2   :  { %15 = vsyncpa [#allocation4], 0 }
   0x3   :  { %17 = vsyncpa [#allocation4 + $0x1], 0  ;;  %s1878_s24 = smov 0   ;;  %s1880_s25 = smov 0  }
   0x4   :  { %s1882_s26 = smov 0   ;;  %s1884_s27 = smov 0  }
   0x5 LB: > { %s1899_s28 = sadd.s32 4294967295, %s1832_s27   ;;  %s1615_s29 = sadd.s32 4294967294, %s1832_s27   ;;  %s1832_s27 = sphi %s1884_s27, %s2811_s27   ;;  %s1828_s26 = sphi %s1882_s26, %s2810_s26   ;;  %s1824_s25 = sphi %s1880_s25, %s2809_s25   ;;  %s1820_s24 = sphi %s1878_s24, %s2808_s24  }
   0x6   : > { %s1903_s30 = sadd.s32 1, %s1832_s27   ;;  %s30_s8 = sadd.s32 1, %s1828_s26 }
   0x7   : > { %s27_s9 = ssub.s32 %s1832_s27, %s1903_s30  ;;  %p37_p0 = scmp.ne.s32.totalorder %s1828_s26, %s1824_s25 }
   0x8   : > { %p28_p1 = scmp.eq.s32.totalorder %s27_s9, 0  ;;  %p38_p2 = scmp.eq.s32.totalorder %s1832_s27, 0 }
   0x9   : > { %p43_p3 = scmp.ne.s32.totalorder %s1824_s25, %s1820_s24  ;;  %p44_p4 = scmp.eq.s32.totalorder %s1899_s28, 0 }
   0xa   : > { %s1915_s10 = scalar_select %p28_p1, %s1828_s26, %s30_s8  }
   0xb   : > { %p1917_p5 = por %p38_p2, %p37_p0  ;;  %p1921_p6 = por %p44_p4, %p43_p3 }
   0xc   : > { %2800 = sst [smem:[#allocation8_spill]] %s1915_s10  ;;  %p193_p7 = scmp.eq.s32.totalorder %s1899_s28, 1 }
   0xd   : > { %p199_p8 = scmp.eq.s32.totalorder %s1615_s29, 1  ;;  %p1679_p10 = scmp.lt.s32.totalorder %s1832_s27, 2 }
   0xe   : > { %p1928_p11 = por %p193_p7, %p37_p0  ;;  %s237_s15 = sand.u32 1, %s1828_s26  }
   0xf   : > { %p1932_p12 = por %p199_p8, %p43_p3  ;;  %s1633_s16 = sshll.u32 %s1832_s27, 4 }
  0x10   : > { %s1618_s17 = sshll.u32 %s237_s15, 4  ;;  %s246_s20 = scalar_lea.hbm %s2792_s0, %s1633_s16 }
  0x11   : > { %s247_s21 = sshll.u32 %s246_s20, 4  ;;  %s241_s22 = scalar_lea.vmem [#allocation2], %s1618_s17  ;;  %s248_s21 = int_to_ptr.hbm [resolvable:$true] %s247_s21 }
  0x12   : > { %s249_s23 = sshll.u32 %s241_s22, 4  ;;  %p1943_p13 = pnand %p1679_p10, %p1917_p5  ;;  %s250_s23 = int_to_ptr.vmem [resolvable:$true] %s249_s23 }
  0x13   : > { %p1621_p0 = scmp.ge.s32.totalorder %s1832_s27, 1  ;;  %p257_p1 = scmp.lt.s32.totalorder %s1832_s27, 3 }
  0x14   : > { %s238_s8 = scalar_lea.sflag [#allocation3], %s237_s15  ;;  %s1736_s9 = sshra.s32 %s248_s21, 4  ;;  %s1737_s9 = int_to_ptr.hbm [resolvable:$true] %s1736_s9 }
  0x15   : > { %s1738_s10 = scalar_lea.hbm %s1737_s9, 16  ;;  %p1740_p3 = pneg %p1943_p13 }
  0x16   : > { %p1739_p2 = scmp.ne.s32.totalorder %s1737_s9, %s1738_s10  ;;  %s1743_s11 = scalar_lea.hbm %s2792_s0, 32 }
  0x17   : > { %p1744_p5 = scmp.lt.s32.totalorder %s1737_s9, %s2792_s0  ;;  %p1745_p8 = scmp.lt.s32.totalorder %s1743_s11, %s1738_s10 }
  0x18   : > { %p1741_p4 = pnand %p1740_p3, %p1739_p2 }
  0x19   : > { %p1746_p10 = por %p1745_p8, %p1744_p5 }
  0x1a   : > { %p1742_p7 = pneg %p1741_p4 }
  0x1c   : > { %p1747_p9 = pnand %p1746_p10, %p1742_p7 }
  0x1e   : > { %1750 = shalt.err (!%p1747_p9)
}
  0x1f   : > { %s1834_s15 = smov 128   ;;  %s1835_s20 = smov 8  }
  0x20   : > { %1674 = dma.hbm_to_vmem [thread:$0]  (!%p1943_p13), %s248_s21, 256, %s250_s23, %s238_s8, %s1834_s15, %s1834_s15, %s1835_s20  }
  0x21   : > { %p258_p2 = pnand %p1621_p0, %p257_p1 }
  0x22   : > { %s1964_s22 = sand.u32 (!%p258_p2), 1, %s1824_s25  }
  0x23   : > { %261 = sbr.rel (%p258_p2) target bundleno = 611 (0x263), region = 48  ;;  %s1622_s10 = sshll.u32 (!%p258_p2), %s1964_s22, 4 }
  0x24   : > { %s264_s9 = scalar_lea.sflag (!%p258_p2), [#allocation3], %s1964_s22  ;;  %s1970_s16 = scalar_lea.vmem (!%p258_p2), [#allocation2], %s1622_s10 }
  0x28   : > { %1811 = dma.done.wait (%p1921_p6), %s264_s9, 256  }
  0x29   : > { %1813 = vsyncadd (%p1921_p6), %s264_s9, 4294967040  ;;  %vm327_vm0 = vcmask 1043456   ;;  %v315_v0 = vld [vmem:[%s2793_s1 + $0x60] sm:$0xf]  ;;  %v314_v1 = vld [vmem:[%s2793_s1 + $0x58] sm:$0xff]  ;;  %vm320_vm1 = vcmask 818176  }
  0x2a   : > { %v313_v2 = vld [vmem:[%s2793_s1 + $0x50] sm:$0xff]  ;;  %v329_v3 = vsel %vm327_vm0, %v315_v0, 0  ;;  %v1985_v4 = vand.u32 4294901760, %v314_v1  ;;  %v312_v6 = vld [vmem:[%s2793_s1 + $0x48] sm:$0xff]  ;;  %v311_v7 = vld [vmem:[%s2793_s1 + $0x40] sm:$0xff]  ;;  %s1634_s12 = sshll.u32 %s1899_s28, 4 }
  0x2b   : > { %v1987_v5 = vand.u32 4294901760, %v313_v2  ;;  %v310_v8 = vld [vmem:[%s2793_s1 + $0x38] sm:$0xff]  ;;  %v1998_v9 = vand.u32 4294901760, %v329_v3  ;;  %v2000_v10 = vand.u32 4294901760, %v312_v6  ;;  %v2002_v11 = vand.u32 4294901760, %v311_v7  ;;  %v309_v13 = vld [vmem:[%s2793_s1 + $0x30] sm:$0xff]  ;;  %s1538_s15 = scalar_lea.hbm %s2799_s7, %s1634_s12 }
  0x2c   : > { %v2004_v12 = vand.u32 4294901760, %v310_v8  ;;  %v2010_v14 = vsub.f32 %v314_v1, %v1985_v4  ;;  %v308_v16 = vld [vmem:[%s2793_s1 + $0x28] sm:$0xff]  ;;  %v2022_v18 = vand.u32 4294901760, %v309_v13  ;;  %v307_v23 = vld [vmem:[%s2793_s1 + $0x20] sm:$0xff]  ;;  %v306_v28 = vld [vmem:[%s2793_s1 + $0x18] sm:$0xff]  ;;  %s298_s20 = scalar_lea.vmem [#allocation5], %s1622_s10 }
  0x2d   : > { %v2013_v15 = vsub.f32 %v313_v2, %v1987_v5  ;;  %335 = vmatpush.msra.mxu0 %v1998_v9  ;;  %v2020_v17 = vsub.f32 %v329_v3, %v1998_v9  ;;  %v2025_v19 = vsub.f32 %v312_v6, %v2000_v10  ;;  %524 = vmatpush.msra.mxu3 %v1998_v9  ;;  %v2042_v26 = vand.u32 4294901760, %v308_v16  ;;  %v305_v37 = vld [vmem:[%s2793_s1 + $0x10] sm:$0xff]  ;;  %v304_v41 = vld [vmem:[%s2793_s1 + $0x8] sm:$0xff]  ;;  %v303_v51 = vld [vmem:[%s2793_s1] sm:$0xff]  ;;  %s1539_s9 = sshll.u32 %s298_s20, 4  ;;  %s1541_s21 = sshll.u32 %s1538_s15, 4  ;;  %s1540_s9 = int_to_ptr.vmem [resolvable:$true] %s1539_s9  ;;  %s1542_s21 = int_to_ptr.hbm [resolvable:$true] %s1541_s21 }
  0x2e   : > { %v2029_v20 = vsub.f32 %v311_v7, %v2002_v11  ;;  %v388_v21 = vand.u32 4294901760, %v2010_v14  ;;  %v2037_v24 = vsub.f32 %v310_v8, %v2004_v12  ;;  %v2061_v33 = vand.u32 4294901760, %v307_v23  ;;  %v301_v43 = vld [vmem:[%s1970_s16] sm:$0xff]  ;;  %v302_v49 = vld [vmem:[%s1970_s16 + $0x8] sm:$0xff]  ;;  %s1527_s28 = scalar_lea.sflag [#allocation4], %s1964_s22  ;;  %s1780_s23 = sshra.s32 %s1542_s21, 4  ;;  %s1781_s23 = int_to_ptr.hbm [resolvable:$true] %s1780_s23 }
  0x2f   : > { %v394_v22 = vand.u32 4294901760, %v2013_v15  ;;  %337 = vmatpush.msra.mxu0 %v1985_v4  ;;  %v382_v25 = vand.u32 4294901760, %v2020_v17  ;;  %472 = vmatpush.msra.mxu2 %v2020_v17  ;;  %v400_v27 = vand.u32 4294901760, %v2025_v19  ;;  %v2064_v34 = vsub.f32 %v309_v13, %v2022_v18  ;;  %s1782_s10 = scalar_lea.hbm %s1781_s23, 16  ;;  %s1786_s8 = scalar_lea.hbm %s2799_s7, 32 }
  0x30   : > { %v389_v29 = vsub.f32 %v2010_v14, %v388_v21  ;;  %v406_v30 = vand.u32 4294901760, %v2029_v20  ;;  %526 = vmatpush.msra.mxu3 %v1985_v4  ;;  %v2066_v35 = vand.u32 4294901760, %v306_v28  ;;  %v412_v36 = vand.u32 4294901760, %v2037_v24  ;;  %p1783_p6 = scmp.ne.s32.totalorder %s1781_s23, %s1782_s10  ;;  %p1787_p0 = scmp.lt.s32.totalorder %s1781_s23, %s2799_s7 }
  0x31   : > { %339 = vmatpush.msra.mxu0 %v1987_v5  ;;  %v383_v31 = vsub.f32 %v2020_v17, %v382_v25  ;;  %v395_v32 = vsub.f32 %v2013_v15, %v394_v22  ;;  %475 = vmatpush.msra.mxu2 %v2010_v14  ;;  %v401_v40 = vsub.f32 %v2025_v19, %v400_v27  ;;  %v2090_v46 = vand.u32 4294901760, %v305_v37  ;;  %p1788_p1 = scmp.lt.s32.totalorder %s1786_s8, %s1782_s10 }
  0x32   : > { %528 = vmatpush.msra.mxu3 %v1987_v5  ;;  %v390_v39 = vand.u32 4294901760, %v389_v29  ;;  %v2082_v42 = vsub.f32 %v308_v16, %v2042_v26  ;;  %v407_v44 = vsub.f32 %v2029_v20, %v406_v30  ;;  %v418_v47 = vand.u32 4294901760, %v2064_v34  ;;  %p1784_p9 = pnand %p1783_p6, %p1928_p11 }
  0x33   : > { %341 = vmatpush.msra.mxu0 %v2000_v10  ;;  %v384_v38 = vand.u32 4294901760, %v383_v31  ;;  %478 = vmatpush.msra.mxu2 %v2013_v15  ;;  %v396_v45 = vand.u32 4294901760, %v395_v32  ;;  %v2094_v48 = vsub.f32 %v307_v23, %v2061_v33  ;;  %v2098_v50 = vand.u32 4294901760, %v304_v41  ;;  %p1789_p3 = por %p1788_p1, %p1787_p0 }
  0x34   : > { %530 = vmatpush.msra.mxu3 %v2000_v10  ;;  %v322_v52 = vsel %vm320_vm1, %v301_v43, 0  ;;  %v402_v53 = vand.u32 4294901760, %v401_v40  ;;  %v413_v54 = vsub.f32 %v2037_v24, %v412_v36  ;;  %v424_v55 = vand.u32 4294901760, %v2082_v42  ;;  %p1785_p13 = pneg %p1784_p9 }
  0x35   : > { %343 = vmatpush.msra.mxu0 %v2002_v11  ;;  %385 = vmatpush.msra.mxu1 %v384_v38  ;;  %v2111_v56 = vsub.f32 %v306_v28, %v2066_v35  ;;  %v408_v57 = vand.u32 4294901760, %v407_v44  ;;  %v2115_v58 = vand.u32 4294901760, %v322_v52  ;;  %v325_v59 = vsel %vm320_vm1, %v302_v49, 0 }
  0x36   : > { %481 = vmatpush.msra.mxu2 %v2025_v19  ;;  %532 = vmatpush.msra.mxu3 %v2002_v11  ;;  %v419_v60 = vsub.f32 %v2064_v34, %v418_v47  ;;  %v2122_v61 = vand.u32 4294901760, %v303_v51  ;;  %v430_v62 = vand.u32 4294901760, %v2094_v48  ;;  %v2126_v63 = vsub.f32 %v305_v37, %v2090_v46  ;;  %v714_v19 = vld [vmem:[%s2795_s3 + $0x60] sm:$0xff]  ;;  %p1790_p4 = pnand %p1789_p3, %p1785_p13 }
  0x37   : > { %345 = vmatpush.msra.mxu0 %v2004_v12  ;;  %391 = vmatpush.msra.mxu1 %v390_v39  ;;  %v2131_v0 = vsub.f32 %v304_v41, %v2098_v50  ;;  %v361_v1 = vsub.f32 %v322_v52, %v2115_v58  ;;  %v414_v2 = vand.u32 4294901760, %v413_v54  ;;  %v425_v3 = vsub.f32 %v2082_v42, %v424_v55 }
  0x38   : > { %484 = vmatpush.msra.mxu2 %v2029_v20  ;;  %534 = vmatpush.msra.mxu3 %v2004_v12  ;;  %v436_v6 = vand.u32 4294901760, %v2111_v56  ;;  %v2139_v7 = vand.u32 4294901760, %v325_v59  ;;  %v420_v13 = vand.u32 4294901760, %v419_v60  ;;  %v431_v16 = vsub.f32 %v2094_v48, %v430_v62 }
  0x39   : > { %347 = vmatpush.msra.mxu0 %v2022_v18  ;;  %397 = vmatpush.msra.mxu1 %v396_v45  ;;  %v362_v8 = vand.u32 4294901760, %v361_v1  ;;  %v442_v23 = vand.u32 4294901760, %v2126_v63  ;;  %v2149_v28 = vsub.f32 %v303_v51, %v2122_v61  ;;  %v448_v29 = vand.u32 4294901760, %v2131_v0 }
  0x3a   : > { %487 = vmatpush.msra.mxu2 %v2037_v24  ;;  %536 = vmatpush.msra.mxu3 %v2022_v18  ;;  %v426_v31 = vand.u32 4294901760, %v425_v3  ;;  %v437_v32 = vsub.f32 %v2111_v56, %v436_v6  ;;  %v369_v38 = vsub.f32 %v325_v59, %v2139_v7  ;;  %v432_v39 = vand.u32 4294901760, %v431_v16  ;;  %v709_v3 = vld [vmem:[%s2795_s3 + $0x38] sm:$0xff] }
  0x3b   : > { %349 = vmatpush.msra.mxu0 %v2042_v26  ;;  %403 = vmatpush.msra.mxu1 %v402_v53  ;;  %v363_v37 = vsub.f32 %v361_v1, %v362_v8  ;;  %v443_v40 = vsub.f32 %v2126_v63, %v442_v23  ;;  %v454_v41 = vand.u32 4294901760, %v2149_v28  ;;  %v449_v44 = vsub.f32 %v2131_v0, %v448_v29 }
  0x3c   : > { %490 = vmatpush.msra.mxu2 %v2064_v34  ;;  %538 = vmatpush.msra.mxu3 %v2042_v26  ;;  %v438_v43 = vand.u32 4294901760, %v437_v32  ;;  %v370_v49 = vand.u32 4294901760, %v369_v38  ;;  %v2259_v24 = vand.u32 4294901760, %v714_v19 }
  0x3d   : > { %351 = vmatpush.msra.mxu0 %v2061_v33  ;;  %409 = vmatpush.msra.mxu1 %v408_v57  ;;  %v364_v45 = vand.u32 4294901760, %v363_v37  ;;  %v444_v51 = vand.u32 4294901760, %v443_v40  ;;  %v455_v52 = vsub.f32 %v2149_v28, %v454_v41  ;;  %v450_v53 = vand.u32 4294901760, %v449_v44 }
  0x3e   : > { %493 = vmatpush.msra.mxu2 %v2082_v42  ;;  %540 = vmatpush.msra.mxu3 %v2061_v33  ;;  %v371_v54 = vsub.f32 %v369_v38, %v370_v49 }
  0x3f   : > { %353 = vmatpush.msra.mxu0 %v2066_v35  ;;  %415 = vmatpush.msra.mxu1 %v414_v2  ;;  %v456_v57 = vand.u32 4294901760, %v455_v52 }
  0x40   : > { %496 = vmatpush.msra.mxu2 %v2094_v48  ;;  %542 = vmatpush.msra.mxu3 %v2066_v35  ;;  %v372_v17 = vand.u32 4294901760, %v371_v54 }
  0x41   : > { %355 = vmatpush.msra.mxu0 %v2090_v46  ;;  %421 = vmatpush.msra.mxu1 %v420_v13  ;;  %v2333_v13 = vand.u32 4294901760, %v709_v3 }
  0x42   : > { %499 = vmatpush.msra.mxu2 %v2111_v56  ;;  %544 = vmatpush.msra.mxu3 %v2090_v46 }
  0x43   : > { %357 = vmatpush.msra.mxu0 %v2098_v50  ;;  %427 = vmatpush.msra.mxu1 %v426_v31  ;;  %v2346_v32 = vsub.f32 %v709_v3, %v2333_v13  ;;  %v702_v3 = vld [vmem:[%s2795_s3] sm:$0xff] }
  0x44   : > { %502 = vmatpush.msra.mxu2 %v2126_v63  ;;  %546 = vmatpush.msra.mxu3 %v2098_v50 }
  0x45   : > { %359 = vmatpush.msra.mxu0 %v2122_v61  ;;  %433 = vmatpush.msra.mxu1 %v432_v39 }
  0x46   : > { %505 = vmatpush.msra.mxu2 %v2131_v0  ;;  %365 = vmatmul.f32.vlgmr.msra.gmra.mxu0 %v364_v45  ;;  %v706_v45 = vld [vmem:[%s2795_s3 + $0x20] sm:$0xff] }
  0x47   : > { %568 = vmatpush.msrb.mxu0 %v382_v25  ;;  %439 = vmatpush.msra.mxu1 %v438_v43  ;;  %v713_v25 = vld [vmem:[%s2795_s3 + $0x58] sm:$0xff] }
  0x48   : > { %508 = vmatpush.msra.mxu2 %v2149_v28  ;;  %548 = vmatpush.msra.mxu3 %v2122_v61  ;;  %v2276_v34 = vand.u32 4294901760, %v713_v25 }
  0x49   : > { %572 = vmatpush.msrb.mxu0 %v388_v21  ;;  %445 = vmatpush.msra.mxu1 %v444_v51 }
  0x4a   : > { %511 = vmatmul.f32.vlgmr.msra.gmra.mxu2 %v361_v1  ;;  %552 = vmatmul.f32.vlgmr.msra.gmra.mxu3 %v362_v8  ;;  %v2290_v48 = vsub.f32 %v713_v25, %v2276_v34 }
  0x4b   : > { %576 = vmatpush.msrb.mxu0 %v394_v22  ;;  %451 = vmatpush.msra.mxu1 %v450_v53  ;;  %v2376_v53 = vand.u32 4294901760, %v706_v45 }
  0x4c   : > { %v797_v60 = vand.u32 4294901760, %v2290_v48 }
  0x4d   : > { %580 = vmatpush.msrb.mxu0 %v400_v27  ;;  %457 = vmatpush.msra.mxu1 %v456_v57  ;;  %v705_v57 = vld [vmem:[%s2795_s3 + $0x18] sm:$0xff] }
  0x4e   : > { %373 = vmatmul.f32.gmra.mxu0 %v372_v17  ;;  %459 = vmatmul.f32.vlgmr.msra.gmra.mxu1 %v2115_v58  ;;  %v798_v2 = vsub.f32 %v2290_v48, %v797_v60 }
  0x4f   : > { %584 = vmatpush.msrb.mxu0 %v406_v30  ;;  %630 = vmatpush.msrb.mxu1 %v1998_v9  ;;  %v716_v9 = vld [vmem:[%s2795_s3 + $0x70] sm:$0xff] }
  0x50   : > { %v799_v16 = vand.u32 4294901760, %v798_v2 }
  0x51   : > { %588 = vmatpush.msrb.mxu0 %v412_v36  ;;  %632 = vmatpush.msrb.mxu1 %v1985_v4  ;;  %v717_v4 = vld [vmem:[%s2795_s3 + $0x78] sm:$0xff] }
  0x52   : > { %516 = vmatmul.f32.gmra.mxu2 %v369_v38  ;;  %558 = vmatmul.f32.gmra.mxu3 %v370_v49  ;;  %v707_v38 = vld [vmem:[%s2795_s3 + $0x28] sm:$0xff] }
  0x53   : > { %592 = vmatpush.msrb.mxu0 %v418_v47  ;;  %634 = vmatpush.msrb.mxu1 %v1987_v5  ;;  %v2225_v5 = vand.u32 4294901760, %v717_v4  ;;  %v2359_v43 = vand.u32 4294901760, %v707_v38 }
  0x55   : > { %596 = vmatpush.msrb.mxu0 %v424_v55  ;;  %636 = vmatpush.msrb.mxu1 %v2000_v10  ;;  %v2231_v10 = vsub.f32 %v717_v4, %v2225_v5  ;;  %v2374_v52 = vsub.f32 %v707_v38, %v2359_v43 }
  0x56   : > { %463 = vmatmul.f32.gmra.mxu1 %v2139_v7  ;;  %723 = vmatpush.msrb.mxu2 %v2225_v5 }
  0x57   : > { %600 = vmatpush.msrb.mxu0 %v430_v62  ;;  %638 = vmatpush.msrb.mxu1 %v2002_v11  ;;  %v2233_v11 = vand.u32 4294901760, %v716_v9  ;;  %v773_v14 = vand.u32 4294901760, %v2231_v10  ;;  %v833_v4 = vand.u32 4294901760, %v2374_v52 }
  0x59   : > { %604 = vmatpush.msrb.mxu0 %v436_v6  ;;  %640 = vmatpush.msrb.mxu1 %v2004_v12  ;;  %v715_v12 = vld [vmem:[%s2795_s3 + $0x68] sm:$0xff]  ;;  %v2242_v15 = vsub.f32 %v716_v9, %v2233_v11  ;;  %v774_v20 = vsub.f32 %v2231_v10, %v773_v14  ;;  %v2387_v9 = vsub.f32 %v706_v45, %v2376_v53 }
  0x5a   : > { %725 = vmatpush.msrb.mxu2 %v2233_v11  ;;  %v834_v25 = vsub.f32 %v2374_v52, %v833_v4 }
  0x5b   : > { %608 = vmatpush.msrb.mxu0 %v442_v23  ;;  %642 = vmatpush.msrb.mxu1 %v2022_v18  ;;  %v2244_v18 = vand.u32 4294901760, %v715_v12  ;;  %v779_v21 = vand.u32 4294901760, %v2242_v15  ;;  %v708_v23 = vld [vmem:[%s2795_s3 + $0x30] sm:$0xff] }
  0x5c   : > { %v2349_v37 = vand.u32 4294901760, %v708_v23 }
  0x5d   : > { %612 = vmatpush.msrb.mxu0 %v448_v29  ;;  %644 = vmatpush.msrb.mxu1 %v2042_v26  ;;  %v2257_v22 = vsub.f32 %v715_v12, %v2244_v18  ;;  %v775_v26 = vand.u32 4294901760, %v774_v20  ;;  %v780_v27 = vsub.f32 %v2242_v15, %v779_v21  ;;  %v704_v20 = vld [vmem:[%s2795_s3 + $0x10] sm:$0xff] }
  0x5e   : > { %727 = vmatpush.msrb.mxu2 %v2244_v18  ;;  %v2364_v44 = vsub.f32 %v708_v23, %v2349_v37 }
  0x5f   : > { %616 = vmatpush.msrb.mxu0 %v454_v41  ;;  %646 = vmatpush.msrb.mxu1 %v2061_v33  ;;  %v785_v30 = vand.u32 4294901760, %v2257_v22  ;;  %v2272_v33 = vsub.f32 %v714_v19, %v2259_v24  ;;  %v781_v36 = vand.u32 4294901760, %v780_v27  ;;  %v821_v41 = vand.u32 4294901760, %v2346_v32 }
  0x60   : > { %618 = vmatmul.f32.vlgmr.msrb.gmra.mxu0 %v2115_v58  ;;  %729 = vmatpush.msrb.mxu2 %v2259_v24  ;;  %v827_v54 = vand.u32 4294901760, %v2364_v44  ;;  %v2394_v19 = vand.u32 4294901760, %v705_v57  ;;  %v2404_v27 = vand.u32 4294901760, %v704_v20 }
  0x61   : > { %648 = vmatpush.msrb.mxu1 %v2066_v35  ;;  %878 = vmatpush.msra.mxu0 %v2231_v10  ;;  %v712_v35 = vld [vmem:[%s2795_s3 + $0x50] sm:$0xff]  ;;  %v786_v42 = vsub.f32 %v2257_v22, %v785_v30  ;;  %v822_v51 = vsub.f32 %v2346_v32, %v821_v41 }
  0x62   : > { %776 = vmatpush.msrb.mxu3 %v775_v26  ;;  %v2286_v47 = vand.u32 4294901760, %v712_v35  ;;  %731 = vmatpush.msrb.mxu2 %v2276_v34  ;;  %v828_v12 = vsub.f32 %v2364_v44, %v827_v54  ;;  %v839_v26 = vand.u32 4294901760, %v2387_v9 }
  0x63   : > { %650 = vmatpush.msrb.mxu1 %v2090_v46  ;;  %881 = vmatpush.msra.mxu0 %v2242_v15  ;;  %v791_v46 = vand.u32 4294901760, %v2272_v33  ;;  %v787_v55 = vand.u32 4294901760, %v786_v42  ;;  %v823_v17 = vand.u32 4294901760, %v822_v51  ;;  %v703_v42 = vld [vmem:[%s2795_s3 + $0x8] sm:$0xff] }
  0x64   : > { %782 = vmatpush.msrb.mxu3 %v781_v36  ;;  %733 = vmatpush.msrb.mxu2 %v2286_v47  ;;  %v2409_v36 = vsub.f32 %v705_v57, %v2394_v19 }
  0x65   : > { %652 = vmatpush.msrb.mxu1 %v2098_v50  ;;  %884 = vmatpush.msra.mxu0 %v2257_v22  ;;  %v711_v50 = vld [vmem:[%s2795_s3 + $0x48] sm:$0xff]  ;;  %v792_v56 = vsub.f32 %v2272_v33, %v791_v46 }
  0x66   : > { %v2303_v59 = vand.u32 4294901760, %v711_v50  ;;  %788 = vmatpush.msrb.mxu3 %v787_v55  ;;  %v840_v55 = vsub.f32 %v2387_v9, %v839_v26  ;;  %v845_v2 = vand.u32 4294901760, %v2409_v36 }
  0x67   : > { %654 = vmatpush.msrb.mxu1 %v2122_v61  ;;  %887 = vmatpush.msra.mxu0 %v2272_v33  ;;  %v710_v61 = vld [vmem:[%s2795_s3 + $0x40] sm:$0xff]  ;;  %v793_v62 = vand.u32 4294901760, %v792_v56  ;;  %v2419_v56 = vsub.f32 %v704_v20, %v2404_v27 }
  0x68   : > { %622 = vmatmul.f32.gmra.mxu0 %v2139_v7  ;;  %656 = vmatmul.f32.vlgmr.msrb.gmra.mxu1 %v2115_v58  ;;  %v2301_v58 = vsub.f32 %v712_v35, %v2286_v47  ;;  %v2313_v0 = vsub.f32 %v711_v50, %v2303_v59  ;;  %v2315_v1 = vand.u32 4294901760, %v710_v61  ;;  %v829_v35 = vand.u32 4294901760, %v828_v12  ;;  %v1717_v12 = vld [vmem:[%s2794_s2] ss:$0 sm:$0xff] }
  0x69   : > { %936 = vmatpush.msra.mxu1 %v2225_v5  ;;  %890 = vmatpush.msra.mxu0 %v2290_v48  ;;  %v835_v50 = vand.u32 4294901760, %v834_v25 }
  0x6a   : > { %v803_v63 = vand.u32 4294901760, %v2301_v58  ;;  %735 = vmatpush.msrb.mxu2 %v2303_v59  ;;  %794 = vmatpush.msrb.mxu3 %v793_v62  ;;  %v2331_v8 = vsub.f32 %v710_v61, %v2315_v1  ;;  %v2421_v61 = vand.u32 4294901760, %v703_v42 }
  0x6b   : > { %938 = vmatpush.msra.mxu1 %v2233_v11  ;;  %893 = vmatpush.msra.mxu0 %v2301_v58 }
  0x6c   : > { %v804_v6 = vsub.f32 %v2301_v58, %v803_v63  ;;  %737 = vmatpush.msrb.mxu2 %v2315_v1  ;;  %v815_v31 = vand.u32 4294901760, %v2331_v8  ;;  %800 = vmatpush.msrb.mxu3 %v799_v16  ;;  %v851_v16 = vand.u32 4294901760, %v2419_v56  ;;  %v2432_v23 = vsub.f32 %v703_v42, %v2421_v61 }
  0x6d   : > { %940 = vmatpush.msra.mxu1 %v2244_v18  ;;  %896 = vmatpush.msra.mxu0 %v2313_v0 }
  0x6e   : > { %v805_v28 = vand.u32 4294901760, %v804_v6  ;;  %739 = vmatpush.msrb.mxu2 %v2333_v13  ;;  %v816_v40 = vsub.f32 %v2331_v8, %v815_v31  ;;  %v841_v6 = vand.u32 4294901760, %v840_v55  ;;  %v852_v38 = vsub.f32 %v2419_v56, %v851_v16 }
  0x6f   : > { %942 = vmatpush.msra.mxu1 %v2259_v24  ;;  %899 = vmatpush.msra.mxu0 %v2331_v8 }
  0x70   : > { %660 = vmatmul.f32.gmra.mxu1 %v2139_v7  ;;  %v809_v7 = vand.u32 4294901760, %v2313_v0  ;;  %806 = vmatpush.msrb.mxu3 %v805_v28  ;;  %v817_v49 = vand.u32 4294901760, %v816_v40  ;;  %v2434_v28 = vand.u32 4294901760, %v702_v3 }
  0x71   : > { %944 = vmatpush.msra.mxu1 %v2276_v34  ;;  %741 = vmatpush.msrb.mxu2 %v2349_v37 }
  0x72   : > { %v810_v29 = vsub.f32 %v2313_v0, %v809_v7  ;;  %902 = vmatpush.msra.mxu0 %v2346_v32  ;;  %v2449_v45 = vsub.f32 %v702_v3, %v2434_v28 }
  0x73   : > { %946 = vmatpush.msra.mxu1 %v2286_v47  ;;  %743 = vmatpush.msrb.mxu2 %v2359_v43 }
  0x74   : > { %v811_v39 = vand.u32 4294901760, %v810_v29  ;;  %905 = vmatpush.msra.mxu0 %v2364_v44  ;;  %v846_v29 = vsub.f32 %v2409_v36, %v845_v2 }
  0x75   : > { %948 = vmatpush.msra.mxu1 %v2303_v59  ;;  %745 = vmatpush.msrb.mxu2 %v2376_v53 }
  0x76   : > { %812 = vmatpush.msrb.mxu3 %v811_v39  ;;  %908 = vmatpush.msra.mxu0 %v2374_v52  ;;  %v857_v39 = vand.u32 4294901760, %v2432_v23  ;;  %v847_v40 = vand.u32 4294901760, %v846_v29 }
  0x77   : > { %950 = vmatpush.msra.mxu1 %v2315_v1  ;;  %747 = vmatpush.msrb.mxu2 %v2394_v19 }
  0x78   : > { %818 = vmatpush.msrb.mxu3 %v817_v49  ;;  %911 = vmatpush.msra.mxu0 %v2387_v9  ;;  %v853_v49 = vand.u32 4294901760, %v852_v38  ;;  %v858_v51 = vsub.f32 %v2432_v23, %v857_v39 }
  0x79   : > { %952 = vmatpush.msra.mxu1 %v2333_v13  ;;  %749 = vmatpush.msrb.mxu2 %v2404_v27 }
  0x7a   : > { %824 = vmatpush.msrb.mxu3 %v823_v17  ;;  %914 = vmatpush.msra.mxu0 %v2409_v36  ;;  %v863_v17 = vand.u32 4294901760, %v2449_v45  ;;  %v859_v20 = vand.u32 4294901760, %v858_v51 }
  0x7b   : > { %954 = vmatpush.msra.mxu1 %v2349_v37  ;;  %751 = vmatpush.msrb.mxu2 %v2421_v61 }
  0x7c   : > { %830 = vmatpush.msrb.mxu3 %v829_v35  ;;  %917 = vmatpush.msra.mxu0 %v2419_v56  ;;  %v864_v10 = vsub.f32 %v2449_v45, %v863_v17 }
  0x7d   : > { %956 = vmatpush.msra.mxu1 %v2359_v43  ;;  %753 = vmatpush.msrb.mxu2 %v2434_v28 }
  0x7e   : > { %836 = vmatpush.msrb.mxu3 %v835_v50  ;;  %920 = vmatpush.msra.mxu0 %v2432_v23  ;;  %v865_v25 = vand.u32 4294901760, %v864_v10 }
  0x7f   : > { %958 = vmatpush.msra.mxu1 %v2376_v53  ;;  %983 = vmatpush.msra.mxu2 %v773_v14 }
  0x80   : > { %842 = vmatpush.msrb.mxu3 %v841_v6  ;;  %923 = vmatpush.msra.mxu0 %v2449_v45 }
  0x81   : > { %960 = vmatpush.msra.mxu1 %v2394_v19  ;;  %987 = vmatpush.msra.mxu2 %v779_v21 }
  0x82   : > { %848 = vmatpush.msrb.mxu3 %v847_v40 }
  0x83   : > { %962 = vmatpush.msra.mxu1 %v2404_v27  ;;  %991 = vmatpush.msra.mxu2 %v785_v30 }
  0x84   : > { %854 = vmatpush.msrb.mxu3 %v853_v49 }
  0x85   : > { %964 = vmatpush.msra.mxu1 %v2421_v61  ;;  %995 = vmatpush.msra.mxu2 %v791_v46 }
  0x86   : > { %860 = vmatpush.msrb.mxu3 %v859_v20 }
  0x87   : > { %966 = vmatpush.msra.mxu1 %v2434_v28  ;;  %999 = vmatpush.msra.mxu2 %v797_v60 }
  0x88   : > { %866 = vmatpush.msrb.mxu3 %v865_v25 }
  0x89   : > { %1003 = vmatpush.msra.mxu2 %v803_v63 }
  0x8a   : > { %1054 = vmatpush.msra.mxu3 %v2225_v5 }
  0x8b   : > { %1007 = vmatpush.msra.mxu2 %v809_v7 }
  0x8c   : > { %1056 = vmatpush.msra.mxu3 %v2233_v11 }
  0x8d   : > { %1011 = vmatpush.msra.mxu2 %v815_v31 }
  0x8e   : > { %1058 = vmatpush.msra.mxu3 %v2244_v18 }
  0x8f   : > { %1015 = vmatpush.msra.mxu2 %v821_v41 }
  0x90   : > { %1060 = vmatpush.msra.mxu3 %v2259_v24 }
  0x91   : > { %1019 = vmatpush.msra.mxu2 %v827_v54 }
  0x92   : > { %1062 = vmatpush.msra.mxu3 %v2276_v34 }
  0x93   : > { %1023 = vmatpush.msra.mxu2 %v833_v4 }
  0x94   : > { %1064 = vmatpush.msra.mxu3 %v2286_v47 }
  0x95   : > { %1027 = vmatpush.msra.mxu2 %v839_v26 }
  0x96   : > { %1066 = vmatpush.msra.mxu3 %v2303_v59 }
  0x97   : > { %1031 = vmatpush.msra.mxu2 %v845_v2 }
  0x98   : > { %1068 = vmatpush.msra.mxu3 %v2315_v1 }
  0x99   : > { %1035 = vmatpush.msra.mxu2 %v851_v16 }
  0x9a   : > { %1070 = vmatpush.msra.mxu3 %v2333_v13 }
  0x9b   : > { %1039 = vmatpush.msra.mxu2 %v857_v39 }
  0x9c   : > { %1072 = vmatpush.msra.mxu3 %v2349_v37 }
  0x9d   : > { %1043 = vmatpush.msra.mxu2 %v863_v17 }
  0x9e   : > { %1074 = vmatpush.msra.mxu3 %v2359_v43 }
  0xa0   : > { %1076 = vmatpush.msra.mxu3 %v2376_v53 }
  0xa2   : > { %1078 = vmatpush.msra.mxu3 %v2394_v19 }
  0xa4   : > { %1080 = vmatpush.msra.mxu3 %v2404_v27 }
  0xa6   : > { %1082 = vmatpush.msra.mxu3 %v2421_v61 }
  0xa8   : > { %1084 = vmatpush.msra.mxu3 %v2434_v28 }
  0xc3   : > { %v366_v62 = vpop.f32.mrf.mxu0 }
  0xc4   : > { %v367_v35 = vadd.f32 %v1717_v12, %v366_v62 }
  0xcb   : > { %v460_v57 = vpop.f32.mrf.mxu1  ;;  %v374_v14 = vpop.f32.mrf.mxu0 }
  0xcc   : > { %v461_v21 = vadd.f32 %v460_v57, %v367_v35  ;;  %v375_v33 = vadd.f32 %v1717_v12, %v374_v14  ;;  %v1147_v57 = vld [vmem:[%s2797_s5 + $0x78] sm:$0xff]  ;;  %v1146_v12 = vld [vmem:[%s2797_s5 + $0x70] sm:$0xff]  ;;  %v1145_v14 = vld [vmem:[%s2797_s5 + $0x68] sm:$0xff] }
  0xcd   : > { %v512_v15 = vpop.f32.mrf.mxu2  ;;  %v553_v30 = vpop.f32.mrf.mxu3  ;;  %v2512_v17 = vand.u32 4294901760, %v1147_v57  ;;  %v2518_v10 = vand.u32 4294901760, %v1146_v12 }
  0xce   : > { %v513_v46 = vadd.f32 %v512_v15, %v461_v21  ;;  %v2528_v15 = vand.u32 4294901760, %v1145_v14  ;;  %v1144_v21 = vld [vmem:[%s2797_s5 + $0x60] sm:$0xff] }
  0xcf   : > { %v1202_v20 = vsub.f32 %v1147_v57, %v2512_v17  ;;  %1153 = vmatpush.msrb.mxu0 %v2512_v17  ;;  %v1208_v35 = vsub.f32 %v1146_v12, %v2518_v10 }
  0xd0   : > { %v554_v11 = vadd.f32 %v553_v30, %v513_v46  ;;  %v2539_v46 = vand.u32 4294901760, %v1144_v21 }
  0xd1   : > { %v2525_v25 = vand.u32 4294901760, %v1202_v20  ;;  %1155 = vmatpush.msrb.mxu0 %v2518_v10  ;;  %v2536_v30 = vand.u32 4294901760, %v1208_v35 }
  0xd3   : > { %v464_v22 = vpop.f32.mrf.mxu1  ;;  %1157 = vmatpush.msrb.mxu0 %v2528_v15 }
  0xd4   : > { %v465_v48 = vadd.f32 %v464_v22, %v375_v33  ;;  %v1204_v22 = vsub.f32 %v1202_v20, %v2525_v25  ;;  %v1214_v33 = vsub.f32 %v1145_v14, %v2528_v15 }
  0xd5   : > { %v517_v18 = vpop.f32.mrf.mxu2  ;;  %v559_v63 = vpop.f32.mrf.mxu3  ;;  %1159 = vmatpush.msrb.mxu0 %v2539_v46 }
  0xd6   : > { %v518_v60 = vadd.f32 %v517_v18, %v465_v48  ;;  %v1210_v48 = vsub.f32 %v1208_v35, %v2536_v30  ;;  %v2547_v18 = vand.u32 4294901760, %v1214_v33 }
  0xd8   : > { %v560_v59 = vadd.f32 %v559_v63, %v518_v60  ;;  %v1142_v60 = vld [vmem:[%s2797_s5 + $0x50] sm:$0xff]  ;;  %v1216_v63 = vsub.f32 %v1214_v33, %v2547_v18 }
  0xdd   : > { %v619_v5 = vpop.f32.mrf.mxu0 }
  0xde   : > { %v620_v58 = vadd.f32 %v619_v5, %v554_v11  ;;  %v1143_v5 = vld [vmem:[%s2797_s5 + $0x58] sm:$0xff]  ;;  %v1205_v11 = vand.u32 4294901760, %v1204_v22 }
  0xe0   : > { %1206 = vmatpush.msrb.mxu1 %v1205_v11 }
  0xe5   : > { %v657_v24 = vpop.f32.mrf.mxu1  ;;  %v623_v0 = vpop.f32.mrf.mxu0 }
  0xe6   : > { %v658_v34 = vadd.f32 %v657_v24, %v620_v58  ;;  %v624_v7 = vadd.f32 %v623_v0, %v560_v59  ;;  %v1220_v58 = vsub.f32 %v1144_v21, %v2539_v46  ;;  %v2551_v24 = vand.u32 4294901760, %v1143_v5 }
  0xe7   : > { %v2560_v0 = vand.u32 4294901760, %v1142_v60 }
  0xe8   : > { %v1624_v47 = vmul.f32 -1.442695, %v658_v34  ;;  %v1211_v34 = vand.u32 4294901760, %v1210_v48  ;;  %v1226_v59 = vsub.f32 %v1143_v5, %v2551_v24  ;;  %1161 = vmatpush.msrb.mxu0 %v2551_v24  ;;  %v1133_v48 = vld [vmem:[%s2797_s5 + $0x8] sm:$0xff] }
  0xea   : > { %1720 = vpow2.f32 %v1624_v47  ;;  %v2558_v47 = vand.u32 4294901760, %v1220_v58  ;;  %1212 = vmatpush.msrb.mxu1 %v1211_v34  ;;  %1163 = vmatpush.msrb.mxu0 %v2560_v0 }
  0xed   : > { %v661_v1 = vpop.f32.mrf.mxu1 }
  0xee   : > { %v662_v8 = vadd.f32 %v661_v1, %v624_v7  ;;  %v1141_v7 = vld [vmem:[%s2797_s5 + $0x48] sm:$0xff]  ;;  %v1217_v1 = vand.u32 4294901760, %v1216_v63 }
  0xf0   : > { %v1721_v13 = vpop.eup %1720  ;;  %v1625_v31 = vmul.f32 -1.442695, %v662_v8  ;;  %v1222_v8 = vsub.f32 %v1220_v58, %v2558_v47  ;;  %1218 = vmatpush.msrb.mxu1 %v1217_v1 }
  0xf1   : > { %v670_v32 = vadd.f32 1.0, %v1721_v13  ;;  %v1232_v13 = vsub.f32 %v1142_v60, %v2560_v0 }
  0xf2   : > { %1722 = vpow2.f32 %v1625_v31  ;;  %v2570_v31 = vand.u32 4294901760, %v1141_v7 }
  0xf3   : > { %1724 = vrcp.f32 %v670_v32  ;;  %v683_v53 = vand.u32 2147483648, %v670_v32  ;;  %v681_v4 = vand.u32 2147483647, %v670_v32  ;;  %vm677_vm3 = vweird.f32 %v670_v32 }
  0xf4   : > { %1165 = vmatpush.msrb.mxu0 %v2570_v31 }
  0xf5   : > { %v684_v26 = vor.u32 1.1754944e-38, %v683_v53  ;;  %vm682_vm5 = vcmp.eq.f32.partialorder %v681_v4, 8.507059e+37 }
  0xf8   : > { %v1723_v37 = vpop.eup %1722 }
  0xf9   : > { %v1725_v41 = vpop.eup %1724  ;;  %v671_v43 = vadd.f32 1.0, %v1723_v37  ;;  %v1140_v37 = vld [vmem:[%s2797_s5 + $0x40] sm:$0xff] }
  0xfa   : > { %v673_v44 = vmul.f32 %v1725_v41, %v670_v32  ;;  %vm678_vm2 = vweird.f32 %v1725_v41  ;;  %v2572_v32 = vand.u32 4294901760, %v1226_v59 }
  0xfb   : > { %1726 = vrcp.f32 %v671_v43  ;;  %vm679_vm4 = vmor %vm677_vm3, %vm678_vm2  ;;  %v698_v56 = vand.u32 2147483648, %v671_v43  ;;  %v696_v2 = vand.u32 2147483647, %v671_v43  ;;  %vm692_vm7 = vweird.f32 %v671_v43 }
  0xfc   : > { %v674_v52 = vsub.f32 1.0, %v673_v44  ;;  %v1238_v44 = vsub.f32 %v1141_v7, %v2570_v31  ;;  %v1228_v53 = vsub.f32 %v1226_v59, %v2572_v32  ;;  %v1132_v7 = vld [vmem:[%s2797_s5] sm:$0xff] }
  0xfd   : > { %v699_v16 = vor.u32 1.1754944e-38, %v698_v56  ;;  %vm697_vm9 = vcmp.eq.f32.partialorder %v696_v2, 8.507059e+37 }
  0xfe   : > { %v675_v54 = vmul.f32 %v1725_v41, %v674_v52  ;;  %v2581_v52 = vand.u32 4294901760, %v1140_v37 }
 0x100   : > { %v676_v9 = vadd.f32 %v1725_v41, %v675_v54  ;;  %v1139_v54 = vld [vmem:[%s2797_s5 + $0x38] sm:$0xff]  ;;  %1167 = vmatpush.msrb.mxu0 %v2581_v52 }
 0x101   : > { %v1727_v19 = vpop.eup %1726 }
 0x102   : > { %v688_v27 = vmul.f32 %v1727_v19, %v671_v43  ;;  %v680_v36 = vsel %vm679_vm4, %v1725_v41, %v676_v9  ;;  %vm693_vm6 = vweird.f32 %v1727_v19  ;;  %v1223_v41 = vand.u32 4294901760, %v1222_v8 }
 0x103   : > { %v685_v42 = vsel %vm682_vm5, %v684_v26, %v680_v36  ;;  %vm694_vm8 = vmor %vm692_vm7, %vm693_vm6  ;;  %v2578_v43 = vand.u32 4294901760, %v1232_v13  ;;  %v2590_v9 = vand.u32 4294901760, %v1238_v44  ;;  %v2593_v26 = vand.u32 4294901760, %v1139_v54  ;;  %v1138_v36 = vld [vmem:[%s2797_s5 + $0x30] sm:$0xff] }
 0x104   : > { %v689_v50 = vsub.f32 1.0, %v688_v27  ;;  %v754_v55 = vand.u32 4294901760, %v685_v42  ;;  %1224 = vmatpush.msrb.mxu1 %v1223_v41  ;;  %v1229_v27 = vand.u32 4294901760, %v1228_v53 }
 0x105   : > { %v1234_v4 = vsub.f32 %v1232_v13, %v2578_v43  ;;  %v1250_v56 = vsub.f32 %v1139_v54, %v2593_v26  ;;  %1169 = vmatpush.msrb.mxu0 %v2593_v26 }
 0x106   : > { %868 = vmatmul.f32.vlgmr.msrb.gmra.mxu3 %v754_v55  ;;  %v755_v61 = vsub.f32 %v685_v42, %v754_v55  ;;  %v690_v62 = vmul.f32 %v1727_v19, %v689_v50  ;;  %v1240_v50 = vsub.f32 %v1238_v44, %v2590_v9  ;;  %1230 = vmatpush.msrb.mxu1 %v1229_v27 }
 0x107   : > { %1366 = vmatpush.msrb.mxu3 %v2512_v17  ;;  %v1235_v42 = vand.u32 4294901760, %v1234_v4 }
 0x108   : > { %926 = vmatmul.f32.vlgmr.msra.gmra.mxu0 %v755_v61  ;;  %v756_v3 = vand.u32 4294901760, %v755_v61  ;;  %v691_v6 = vadd.f32 %v1727_v19, %v690_v62  ;;  %v1137_v62 = vld [vmem:[%s2797_s5 + $0x28] sm:$0xff]  ;;  %v1241_v2 = vand.u32 4294901760, %v1240_v50  ;;  %v1718_v50 = vld [vmem:[%s2796_s4] ss:$0 sm:$0xff] }
 0x109   : > { %1368 = vmatpush.msrb.mxu3 %v2518_v10  ;;  %1236 = vmatpush.msrb.mxu1 %v1235_v42 }
 0x10a   : > { %970 = vmatmul.f32.vlgmr.msra.gmra.mxu1 %v756_v3  ;;  %v757_v23 = vsub.f32 %v755_v61, %v756_v3  ;;  %v695_v28 = vsel %vm694_vm8, %v1727_v19, %v691_v6  ;;  %v1244_v19 = vsub.f32 %v1140_v37, %v2581_v52  ;;  %v2605_v61 = vand.u32 4294901760, %v1138_v36 }
 0x10b   : > { %v700_v29 = vsel %vm697_vm9, %v699_v16, %v695_v28  ;;  %1370 = vmatpush.msrb.mxu3 %v2528_v15  ;;  %v2611_v6 = vand.u32 4294901760, %v1250_v56  ;;  %v2613_v16 = vand.u32 4294901760, %v1137_v62  ;;  %v1136_v28 = vld [vmem:[%s2797_s5 + $0x20] sm:$0xff]  ;;  %1242 = vmatpush.msrb.mxu1 %v1241_v2  ;;  %v2668_v37 = vand.u32 4294901760, %v1132_v7 }
 0x10c   : > { %v758_v38 = vand.u32 4294901760, %v757_v23  ;;  %v762_v39 = vand.u32 4294901760, %v700_v29  ;;  %v1256_v23 = vsub.f32 %v1138_v36, %v2605_v61  ;;  %1171 = vmatpush.msrb.mxu0 %v2605_v61 }
 0x10d   : > { %1372 = vmatpush.msrb.mxu3 %v2539_v46  ;;  %v1292_v54 = vsub.f32 %v1132_v7, %v2668_v37 }
 0x10e   : > { %759 = vmatmul.f32.vlgmr.msrb.gmra.mxu2 %v758_v38  ;;  %872 = vmatmul.f32.gmra.mxu3 %v762_v39  ;;  %v763_v40 = vsub.f32 %v700_v29, %v762_v39  ;;  %v1252_v38 = vsub.f32 %v1250_v56, %v2611_v6 }
 0x10f   : > { %1308 = vmatpush.msrb.mxu2 %v1202_v20  ;;  %1374 = vmatpush.msrb.mxu3 %v2551_v24  ;;  %v2679_v36 = vand.u32 4294901760, %v1292_v54 }
 0x110   : > { %931 = vmatmul.f32.gmra.mxu0 %v763_v40  ;;  %v764_v45 = vand.u32 4294901760, %v763_v40 }
 0x111   : > { %1311 = vmatpush.msrb.mxu2 %v1208_v35  ;;  %1376 = vmatpush.msrb.mxu3 %v2560_v0  ;;  %v1134_v35 = vld [vmem:[%s2797_s5 + $0x10] sm:$0xff] }
 0x112   : > { %976 = vmatmul.f32.gmra.mxu1 %v764_v45  ;;  %v765_v49 = vsub.f32 %v763_v40, %v764_v45  ;;  %v2623_v40 = vand.u32 4294901760, %v1136_v28  ;;  %v2627_v45 = vand.u32 4294901760, %v1256_v23  ;;  %1173 = vmatpush.msrb.mxu0 %v2613_v16  ;;  %v2647_v5 = vand.u32 4294901760, %v1134_v35 }
 0x113   : > { %1314 = vmatpush.msrb.mxu2 %v1214_v33  ;;  %1378 = vmatpush.msrb.mxu3 %v2570_v31 }
 0x114   : > { %v766_v51 = vand.u32 4294901760, %v765_v49  ;;  %v1135_v49 = vld [vmem:[%s2797_s5 + $0x18] sm:$0xff]  ;;  %v1268_v12 = vsub.f32 %v1136_v28, %v2623_v40  ;;  %v1258_v14 = vsub.f32 %v1256_v23, %v2627_v45  ;;  %1175 = vmatpush.msrb.mxu0 %v2623_v40  ;;  %v1280_v63 = vsub.f32 %v1134_v35, %v2647_v5 }
 0x115   : > { %1317 = vmatpush.msrb.mxu2 %v1220_v58  ;;  %1380 = vmatpush.msrb.mxu3 %v2581_v52  ;;  %v2635_v20 = vand.u32 4294901760, %v1135_v49 }
 0x116   : > { %767 = vmatmul.f32.gmra.mxu2 %v766_v51  ;;  %1086 = vmatmul.f32.vlgmr.msra.gmra.mxu3 %v754_v55  ;;  %v1253_v51 = vand.u32 4294901760, %v1252_v38  ;;  %v2644_v22 = vand.u32 4294901760, %v1268_v12  ;;  %v1259_v11 = vand.u32 4294901760, %v1258_v14 }
 0x117   : > { %1320 = vmatpush.msrb.mxu2 %v1226_v59  ;;  %1382 = vmatpush.msrb.mxu3 %v2593_v26  ;;  %v1274_v33 = vsub.f32 %v1135_v49, %v2635_v20  ;;  %v2660_v59 = vand.u32 4294901760, %v1133_v48 }
 0x118   : > { %v1270_v60 = vsub.f32 %v1268_v12, %v2644_v22  ;;  %1177 = vmatpush.msrb.mxu0 %v2635_v20 }
 0x119   : > { %1323 = vmatpush.msrb.mxu2 %v1232_v13  ;;  %1384 = vmatpush.msrb.mxu3 %v2605_v61  ;;  %v2655_v34 = vand.u32 4294901760, %v1274_v33  ;;  %v2666_v13 = vand.u32 4294901760, %v1280_v63  ;;  %v1286_v41 = vsub.f32 %v1133_v48, %v2660_v59 }
 0x11a   : > { %v1271_v1 = vand.u32 4294901760, %v1270_v60  ;;  %1179 = vmatpush.msrb.mxu0 %v2647_v5 }
 0x11b   : > { %1326 = vmatpush.msrb.mxu2 %v1238_v44  ;;  %1386 = vmatpush.msrb.mxu3 %v2613_v16  ;;  %v1276_v8 = vsub.f32 %v1274_v33, %v2655_v34  ;;  %v1282_v53 = vsub.f32 %v1280_v63, %v2666_v13 }
 0x11c   : > { %1181 = vmatpush.msrb.mxu0 %v2660_v59 }
 0x11d   : > { %1329 = vmatpush.msrb.mxu2 %v1244_v19  ;;  %1388 = vmatpush.msrb.mxu3 %v2623_v40  ;;  %v1277_v44 = vand.u32 4294901760, %v1276_v8  ;;  %v1283_v27 = vand.u32 4294901760, %v1282_v53 }
 0x11e   : > { %1045 = vmatmul.f32.vlgmr.msra.gmra.mxu2 %v754_v55  ;;  %1090 = vmatmul.f32.gmra.mxu3 %v762_v39  ;;  %v2601_v55 = vand.u32 4294901760, %v1244_v19 }
 0x11f   : > { %1332 = vmatpush.msrb.mxu2 %v1250_v56  ;;  %1390 = vmatpush.msrb.mxu3 %v2635_v20  ;;  %v1294_v56 = vsub.f32 %v1292_v54, %v2679_v36 }
 0x120   : > { %v1246_v3 = vsub.f32 %v1244_v19, %v2601_v55  ;;  %v2677_v19 = vand.u32 4294901760, %v1286_v41  ;;  %1183 = vmatpush.msrb.mxu0 %v2668_v37 }
 0x121   : > { %1335 = vmatpush.msrb.mxu2 %v1256_v23  ;;  %1392 = vmatpush.msrb.mxu3 %v2647_v5 }
 0x122   : > { %v1247_v29 = vand.u32 4294901760, %v1246_v3  ;;  %v1288_v42 = vsub.f32 %v1286_v41, %v2677_v19  ;;  %1413 = vmatpush.msra.mxu0 %v2525_v25  ;;  %v1295_v3 = vand.u32 4294901760, %v1294_v56 }
 0x123   : > { %1394 = vmatpush.msrb.mxu3 %v2660_v59 }
 0x124   : > { %1248 = vmatpush.msrb.mxu1 %v1247_v29  ;;  %v1289_v2 = vand.u32 4294901760, %v1288_v42  ;;  %1417 = vmatpush.msra.mxu0 %v2536_v30 }
 0x125   : > { %1396 = vmatpush.msrb.mxu3 %v2668_v37 }
 0x126   : > { %1049 = vmatmul.f32.gmra.mxu2 %v762_v39  ;;  %v1262_v39 = vsub.f32 %v1137_v62, %v2613_v16  ;;  %1254 = vmatpush.msrb.mxu1 %v1253_v51 }
 0x127   : > { %1651 = vmatpush.msra.mxu3 %v2512_v17  ;;  %1421 = vmatpush.msra.mxu0 %v2547_v18 }
 0x128   : > { %v2632_v57 = vand.u32 4294901760, %v1262_v39  ;;  %1338 = vmatpush.msrb.mxu2 %v1262_v39  ;;  %1260 = vmatpush.msrb.mxu1 %v1259_v11 }
 0x129   : > { %1652 = vmatpush.msra.mxu3 %v2518_v10  ;;  %1425 = vmatpush.msra.mxu0 %v2558_v47 }
 0x12a   : > { %v1264_v21 = vsub.f32 %v1262_v39, %v2632_v57  ;;  %1341 = vmatpush.msrb.mxu2 %v1268_v12 }
 0x12b   : > { %1653 = vmatpush.msra.mxu3 %v2528_v15  ;;  %1429 = vmatpush.msra.mxu0 %v2572_v32 }
 0x12c   : > { %v1265_v58 = vand.u32 4294901760, %v1264_v21  ;;  %1344 = vmatpush.msrb.mxu2 %v1274_v33 }
 0x12d   : > { %1654 = vmatpush.msra.mxu3 %v2539_v46  ;;  %1433 = vmatpush.msra.mxu0 %v2578_v43 }
 0x12e   : > { %1266 = vmatpush.msrb.mxu1 %v1265_v58  ;;  %1347 = vmatpush.msrb.mxu2 %v1280_v63 }
 0x12f   : > { %1655 = vmatpush.msra.mxu3 %v2551_v24  ;;  %1437 = vmatpush.msra.mxu0 %v2590_v9 }
 0x130   : > { %1272 = vmatpush.msrb.mxu1 %v1271_v1  ;;  %1350 = vmatpush.msrb.mxu2 %v1286_v41 }
 0x131   : > { %1656 = vmatpush.msra.mxu3 %v2560_v0  ;;  %1441 = vmatpush.msra.mxu0 %v2601_v55 }
 0x132   : > { %1278 = vmatpush.msrb.mxu1 %v1277_v44  ;;  %1353 = vmatpush.msrb.mxu2 %v1292_v54 }
 0x133   : > { %1657 = vmatpush.msra.mxu3 %v2570_v31  ;;  %1445 = vmatpush.msra.mxu0 %v2611_v6 }
 0x134   : > { %1635 = vmatpush.msra.mxu2 %v2525_v25  ;;  %1284 = vmatpush.msrb.mxu1 %v1283_v27 }
 0x135   : > { %1658 = vmatpush.msra.mxu3 %v2581_v52  ;;  %1449 = vmatpush.msra.mxu0 %v2627_v45 }
 0x136   : > { %1636 = vmatpush.msra.mxu2 %v2536_v30  ;;  %1290 = vmatpush.msrb.mxu1 %v1289_v2 }
 0x137   : > { %1659 = vmatpush.msra.mxu3 %v2593_v26  ;;  %1453 = vmatpush.msra.mxu0 %v2632_v57 }
 0x138   : > { %1637 = vmatpush.msra.mxu2 %v2547_v18  ;;  %1296 = vmatpush.msrb.mxu1 %v1295_v3 }
 0x139   : > { %1660 = vmatpush.msra.mxu3 %v2605_v61  ;;  %1457 = vmatpush.msra.mxu0 %v2644_v22 }
 0x13a   : > { %1484 = vmatpush.msra.mxu1 %v2512_v17  ;;  %1638 = vmatpush.msra.mxu2 %v2558_v47 }
 0x13b   : > { %1661 = vmatpush.msra.mxu3 %v2613_v16  ;;  %1461 = vmatpush.msra.mxu0 %v2655_v34 }
 0x13c   : > { %1486 = vmatpush.msra.mxu1 %v2518_v10  ;;  %1639 = vmatpush.msra.mxu2 %v2572_v32 }
 0x13d   : > { %1662 = vmatpush.msra.mxu3 %v2623_v40  ;;  %1465 = vmatpush.msra.mxu0 %v2666_v13 }
 0x13e   : > { %1488 = vmatpush.msra.mxu1 %v2528_v15  ;;  %1640 = vmatpush.msra.mxu2 %v2578_v43 }
 0x13f   : > { %1663 = vmatpush.msra.mxu3 %v2635_v20  ;;  %1469 = vmatpush.msra.mxu0 %v2677_v19 }
 0x140   : > { %1490 = vmatpush.msra.mxu1 %v2539_v46  ;;  %1641 = vmatpush.msra.mxu2 %v2590_v9 }
 0x141   : > { %1664 = vmatpush.msra.mxu3 %v2647_v5  ;;  %1473 = vmatpush.msra.mxu0 %v2679_v36 }
 0x142   : > { %1492 = vmatpush.msra.mxu1 %v2551_v24  ;;  %1642 = vmatpush.msra.mxu2 %v2601_v55 }
 0x143   : > { %1665 = vmatpush.msra.mxu3 %v2660_v59 }
 0x144   : > { %1494 = vmatpush.msra.mxu1 %v2560_v0  ;;  %1643 = vmatpush.msra.mxu2 %v2611_v6 }
 0x145   : > { %1666 = vmatpush.msra.mxu3 %v2668_v37 }
 0x146   : > { %1496 = vmatpush.msra.mxu1 %v2570_v31  ;;  %1644 = vmatpush.msra.mxu2 %v2627_v45 }
 0x148   : > { %1498 = vmatpush.msra.mxu1 %v2581_v52  ;;  %1645 = vmatpush.msra.mxu2 %v2632_v57 }
 0x14a   : > { %1500 = vmatpush.msra.mxu1 %v2593_v26  ;;  %1646 = vmatpush.msra.mxu2 %v2644_v22 }
 0x14c   : > { %1502 = vmatpush.msra.mxu1 %v2605_v61  ;;  %1647 = vmatpush.msra.mxu2 %v2655_v34 }
 0x14e   : > { %1504 = vmatpush.msra.mxu1 %v2613_v16  ;;  %1648 = vmatpush.msra.mxu2 %v2666_v13 }
 0x150   : > { %1506 = vmatpush.msra.mxu1 %v2623_v40  ;;  %1649 = vmatpush.msra.mxu2 %v2677_v19 }
 0x152   : > { %1508 = vmatpush.msra.mxu1 %v2635_v20  ;;  %1650 = vmatpush.msra.mxu2 %v2679_v36 }
 0x154   : > { %1510 = vmatpush.msra.mxu1 %v2647_v5 }
 0x156   : > { %1512 = vmatpush.msra.mxu1 %v2660_v59 }
 0x158   : > { %1514 = vmatpush.msra.mxu1 %v2668_v37 }
 0x185   : > { %v927_v30 = vpop.f32.mrf.mxu0 }
 0x187   : > { %v971_v10 = vpop.f32.mrf.mxu1 }
 0x189   : > { %v869_v4 = vpop.f32.mrf.mxu3 }
 0x18d   : > { %v932_v24 = vpop.f32.mrf.mxu0 }
 0x18f   : > { %v977_v31 = vpop.f32.mrf.mxu1 }
 0x191   : > { %v760_v62 = vpop.f32.mrf.mxu2  ;;  %v873_v25 = vpop.f32.mrf.mxu3 }
 0x192   : > { %v761_v23 = vadd.f32 %v1718_v50, %v760_v62 }
 0x194   : > { %v870_v28 = vadd.f32 %v869_v4, %v761_v23 }
 0x196   : > { %v928_v18 = vadd.f32 %v927_v30, %v870_v28 }
 0x198   : > { %v972_v47 = vadd.f32 %v971_v10, %v928_v18 }
 0x199   : > { %v768_v29 = vpop.f32.mrf.mxu2  ;;  %v1087_v46 = vpop.f32.mrf.mxu3 }
 0x19a   : > { %v769_v17 = vadd.f32 %v1718_v50, %v768_v29  ;;  %v1719_v50 = vld [vmem:[%s2798_s6] ss:$0 sm:$0xff] }
 0x19c   : > { %v874_v15 = vadd.f32 %v873_v25, %v769_v17 }
 0x19e   : > { %v933_v0 = vadd.f32 %v932_v24, %v874_v15 }
 0x1a0   : > { %v978_v6 = vadd.f32 %v977_v31, %v933_v0 }
 0x1a1   : > { %v1046_v32 = vpop.f32.mrf.mxu2  ;;  %v1091_v26 = vpop.f32.mrf.mxu3 }
 0x1a2   : > { %v1047_v43 = vadd.f32 %v1046_v32, %v972_v47 }
 0x1a4   : > { %v1088_v9 = vadd.f32 %v1087_v46, %v1047_v43 }
 0x1a6   : > { %v1626_v55 = vmul.f32 -1.442695, %v1088_v9 }
 0x1a8   : > { %1728 = vpow2.f32 %v1626_v55 }
 0x1a9   : > { %v1050_v52 = vpop.f32.mrf.mxu2 }
 0x1aa   : > { %v1051_v38 = vadd.f32 %v1050_v52, %v978_v6 }
 0x1ac   : > { %v1092_v39 = vadd.f32 %v1091_v26, %v1051_v38 }
 0x1ae   : > { %v1729_v61 = vpop.eup %1728  ;;  %v1627_v45 = vmul.f32 -1.442695, %v1092_v39 }
 0x1af   : > { %v1100_v16 = vadd.f32 1.0, %v1729_v61 }
 0x1b0   : > { %1730 = vpow2.f32 %v1627_v45 }
 0x1b1   : > { %1732 = vrcp.f32 %v1100_v16  ;;  %v1113_v20 = vand.u32 2147483648, %v1100_v16  ;;  %v1111_v35 = vand.u32 2147483647, %v1100_v16  ;;  %vm1107_vm11 = vweird.f32 %v1100_v16 }
 0x1b3   : > { %v1114_v33 = vor.u32 1.1754944e-38, %v1113_v20  ;;  %vm1112_vm13 = vcmp.eq.f32.partialorder %v1111_v35, 8.507059e+37 }
 0x1b6   : > { %v1731_v40 = vpop.eup %1730 }
 0x1b7   : > { %v1733_v49 = vpop.eup %1732  ;;  %v1101_v51 = vadd.f32 1.0, %v1731_v40 }
 0x1b8   : > { %v1103_v57 = vmul.f32 %v1733_v49, %v1100_v16  ;;  %vm1108_vm10 = vweird.f32 %v1733_v49 }
 0x1b9   : > { %1734 = vrcp.f32 %v1101_v51  ;;  %vm1109_vm12 = vmor %vm1107_vm11, %vm1108_vm10  ;;  %v1128_v34 = vand.u32 2147483648, %v1101_v51  ;;  %v1126_v7 = vand.u32 2147483647, %v1101_v51  ;;  %vm1122_vm15 = vweird.f32 %v1101_v51 }
 0x1ba   : > { %v1104_v12 = vsub.f32 1.0, %v1103_v57 }
 0x1bb   : > { %v1129_v13 = vor.u32 1.1754944e-38, %v1128_v34  ;;  %vm1127_vm2 = vcmp.eq.f32.partialorder %v1126_v7, 8.507059e+37 }
 0x1bc   : > { %v1105_v14 = vmul.f32 %v1733_v49, %v1104_v12 }
 0x1be   : > { %v1106_v21 = vadd.f32 %v1733_v49, %v1105_v14 }
 0x1bf   : > { %v1735_v22 = vpop.eup %1734 }
 0x1c0   : > { %v1118_v5 = vmul.f32 %v1735_v22, %v1101_v51  ;;  %v1110_v11 = vsel %vm1109_vm12, %v1733_v49, %v1106_v21  ;;  %vm1123_vm14 = vweird.f32 %v1735_v22 }
 0x1c1   : > { %v1115_v48 = vsel %vm1112_vm13, %v1114_v33, %v1110_v11  ;;  %vm1124_vm0 = vmor %vm1122_vm15, %vm1123_vm14 }
 0x1c2   : > { %v1119_v58 = vsub.f32 1.0, %v1118_v5  ;;  %v1184_v60 = vand.u32 4294901760, %v1115_v48 }
 0x1c4   : > { %1298 = vmatmul.f32.vlgmr.msrb.gmra.mxu1 %v1184_v60  ;;  %v1185_v63 = vsub.f32 %v1115_v48, %v1184_v60  ;;  %v1120_v59 = vmul.f32 %v1735_v22, %v1119_v58 }
 0x1c6   : > { %1356 = vmatmul.f32.vlgmr.msrb.gmra.mxu2 %v1185_v63  ;;  %v1186_v1 = vand.u32 4294901760, %v1185_v63  ;;  %v1121_v8 = vadd.f32 %v1735_v22, %v1120_v59 }
 0x1c8   : > { %1400 = vmatmul.f32.vlgmr.msrb.gmra.mxu3 %v1186_v1  ;;  %v1187_v37 = vsub.f32 %v1185_v63, %v1186_v1  ;;  %v1125_v41 = vsel %vm1124_vm0, %v1735_v22, %v1121_v8 }
 0x1c9   : > { %v1130_v44 = vsel %vm1127_vm2, %v1129_v13, %v1125_v41 }
 0x1ca   : > { %v1188_v53 = vand.u32 4294901760, %v1187_v37  ;;  %v1192_v54 = vand.u32 4294901760, %v1130_v44 }
 0x1cc   : > { %1189 = vmatmul.f32.vlgmr.msrb.gmra.mxu0 %v1188_v53  ;;  %1302 = vmatmul.f32.gmra.mxu1 %v1192_v54  ;;  %v1193_v4 = vsub.f32 %v1130_v44, %v1192_v54 }
 0x1ce   : > { %1361 = vmatmul.f32.gmra.mxu2 %v1193_v4  ;;  %v1194_v19 = vand.u32 4294901760, %v1193_v4 }
 0x1d0   : > { %1406 = vmatmul.f32.gmra.mxu3 %v1194_v19  ;;  %v1195_v27 = vsub.f32 %v1193_v4, %v1194_v19 }
 0x1d2   : > { %v1196_v36 = vand.u32 4294901760, %v1195_v27 }
 0x1d4   : > { %1197 = vmatmul.f32.gmra.mxu0 %v1196_v36  ;;  %1516 = vmatmul.f32.vlgmr.msra.gmra.mxu1 %v1184_v60 }
 0x1d6   : > { %1479 = vmatmul.f32.vlgmr.msra.gmra.mxu2 %v1192_v54 }
 0x1d8   : > { %1520 = vmatmul.f32.vlgmr.msra.gmra.mxu3 %v1192_v54 }
 0x1dc   : > { %1475 = vmatmul.f32.vlgmr.msra.gmra.mxu0 %v1184_v60 }
 0x241   : > { %v1299_v42 = vpop.f32.mrf.mxu1 }
 0x249   : > { %v1190_v56 = vpop.f32.mrf.mxu0  ;;  %v1357_v62 = vpop.f32.mrf.mxu2 }
 0x24a   : > { %v1191_v3 = vadd.f32 %v1719_v50, %v1190_v56  ;;  %v1303_v25 = vpop.f32.mrf.mxu1 }
 0x24b   : > { %v1401_v2 = vpop.f32.mrf.mxu3 }
 0x24c   : > { %v1300_v23 = vadd.f32 %v1299_v42, %v1191_v3 }
 0x24e   : > { %v1358_v18 = vadd.f32 %v1357_v62, %v1300_v23 }
 0x250   : > { %v1402_v47 = vadd.f32 %v1401_v2, %v1358_v18 }
 0x251   : > { %v1198_v28 = vpop.f32.mrf.mxu0  ;;  %v1362_v29 = vpop.f32.mrf.mxu2 }
 0x252   : > { %v1199_v30 = vadd.f32 %v1719_v50, %v1198_v28  ;;  %v1517_v9 = vpop.f32.mrf.mxu1 }
 0x253   : > { %v1407_v17 = vpop.f32.mrf.mxu3 }
 0x254   : > { %v1304_v10 = vadd.f32 %v1303_v25, %v1199_v30 }
 0x256   : > { %v1363_v15 = vadd.f32 %v1362_v29, %v1304_v10 }
 0x258   : > { %v1408_v46 = vadd.f32 %v1407_v17, %v1363_v15 }
 0x259   : > { %v1476_v32 = vpop.f32.mrf.mxu0  ;;  %v1480_v24 = vpop.f32.mrf.mxu2 }
 0x25a   : > { %v1477_v43 = vadd.f32 %v1476_v32, %v1402_v47  ;;  %v1481_v0 = vadd.f32 %v1480_v24, %v1408_v46 }
 0x25b   : > { %v1521_v55 = vpop.f32.mrf.mxu3 }
 0x25c   : > { %v1518_v31 = vadd.f32 %v1517_v9, %v1477_v43  ;;  %v1522_v6 = vadd.f32 %v1521_v55, %v1481_v0 }
 0x25e   : > { %1524 = vst.msk [vmem:[%s298_s20] sm:$0xff] %vm320_vm1, %v1518_v31 }
 0x25f   : > { %1525 = vst.msk [vmem:[%s298_s20 + $0x8] sm:$0xff] %vm320_vm1, %v1522_v6 }
 0x260   : > { %1793 = shalt.err (!%p1790_p4)
}
 0x261   : > { %s1836_s22 = smov 128   ;;  %s1837_s12 = smov 8  }
 0x262   : > { %1669 = dma.vmem_to_hbm [thread:$0]  (%p1928_p11), %s1540_s9, 256, %s1542_s21, %s1527_s28, %s1836_s22, %s1836_s22, %s1837_s12  }
 0x263 PF: > { %s1556_s18 = sand.u32 1, %s1820_s24   ;;  %p2806_p7 = scmp.ge.s32.totalorder %s1832_s27, 2 }
 0x264   : > { %s1557_s19 = scalar_lea.sflag [#allocation4], %s1556_s18 }
 0x265   : > { %p1676_p5 = pnand %p2806_p7, %p1932_p12 }
 0x267   : > { %p1677_p8 = pneg %p1676_p5 }
 0x269   : > { %1815 = dma.done.wait (%p1677_p8), %s1557_s19, 256  }
 0x26a   : > { %1817 = vsyncadd (%p1677_p8), %s1557_s19, 4294967040  ;;  %s2807_s15 = sld [smem:[#allocation8_spill]]  ;;  %p20_p10 = scmp.ge.s32.totalorder %s1903_s30, 4  }
 0x26b   : > { %s2808_s24 = smov %s1824_s25  ;;  %s2809_s25 = smov %s1828_s26 }
 0x26c   : > { %s2811_s27 = smov %s1903_s30  ;;  %22 = sbr.rel (!%p20_p10) target bundleno = 5 (0x5), region = 93 }
 0x270   : > { %s2810_s26 = smov %s2807_s15 }
 0x271   :  { %1563 = vsyncpa [#allocation3], 1 }
 0x272   :  { %1565 = vsyncpa [#allocation3 + $0x1], 1 }
 0x273   :  { %1566 = vsyncpa [#allocation4], 1 }
 0x274   :  { %1568 = vsyncpa [#allocation4 + $0x1], 1 }

</bundles_post_ra>
